<compile_context>
chip_gen: v7x
topology: tpu7x:2x2x1
jax: 0.10.0
libtpu: 0.0.40
codegen_flags: <defaults>
</compile_context>

<pallas_src>
import jax
import jax.numpy as jnp
from jax.experimental import pallas as pl
from jax.experimental.pallas import tpu as pltpu


# ---------------------------------------------------------------------------
# Kernels
# ---------------------------------------------------------------------------

def _mlp_kernel_cmajor(xT_ref, w1T_ref, w2Ts_ref, bias_ref, oT_ref):
    """Channel-major path (tokens on the 128-lane axis), used when C_out < 128.

    xT_ref:   (C, TM)         activation tile, channel-major
    w1T_ref:  (HID, C)        fc1 weight^T, VMEM-resident
    w2Ts_ref: (Cp, HID)       StarReLU-scale-folded fc2 weight^T, resident (Cp = C_out pad8)
    bias_ref: (Cp, 1)         folded StarReLU bias column (f32)
    oT_ref:   (Cp, TM)        lane-dense, sublane-full output tile
    """
    hT = jnp.dot(w1T_ref[...], xT_ref[...], preferred_element_type=jnp.float32)
    hT = jnp.maximum(hT, 0.0)
    hT = hT * hT                                   # relu(z)^2 in f32 (scale folded into w2)
    # drop1: p == 0.0 -> identity
    outT = jnp.dot(w2Ts_ref[...], hT.astype(w2Ts_ref.dtype),
                   preferred_element_type=jnp.float32)
    oT_ref[...] = (outT + bias_ref[...]).astype(oT_ref.dtype)
    # drop2: p == 0.0 -> identity


def _mlp_kernel_tmajor(x_ref, w1_ref, w2s_ref, bias_ref, o_ref):
    """Token-major path (channels on the lane axis), used when C, C_out >= 128."""
    h = jnp.dot(x_ref[...], w1_ref[...], preferred_element_type=jnp.float32)
    h = jnp.maximum(h, 0.0)
    h = h * h
    out = jnp.dot(h.astype(w2s_ref.dtype), w2s_ref[...],
                  preferred_element_type=jnp.float32)
    o_ref[...] = (out + bias_ref[...]).astype(o_ref.dtype)


# ---------------------------------------------------------------------------
# Wrapper helpers
# ---------------------------------------------------------------------------

def _vmem_cap_bytes():
    """Usable VMEM per TensorCore minus headroom for compiler scratch."""
    try:
        cap = int(pltpu.get_tpu_info().vmem_capacity_bytes)
    except Exception:
        cap = 64 << 20                      # v7x has the smallest per-TC VMEM
    return max(cap - (12 << 20), 16 << 20)


def _pick_tile(M, per_token_bytes, weight_bytes, cap, tm_ceiling=2048):
    """Largest token tile (multiple of 128, <= tm_ceiling) whose double-buffered
    activation tiles + resident weights + f32 temporaries fit the VMEM budget.
    Small problems collapse to a single grid step (tile == M): no padding, no
    pipeline prologue, and no megacore split of microsecond-scale work."""
    slack = 2 << 20
    avail = max(cap - weight_bytes - slack, 1 << 20)
    tm_max = int(avail // max(per_token_bytes, 1))
    tm_max = max(128, min(tm_ceiling, (tm_max // 128) * 128))
    if M <= tm_max:
        return M, 1
    # Trailing partial block (if M % tm != 0) is masked by Pallas; no host-side pad.
    return tm_max, pl.cdiv(M, tm_max)


def _weight_spec(shape, resident_mode):
    """BlockSpec for a VMEM-resident operand (constant index_map across the grid)."""
    index_map = lambda i: (0,) * len(shape)
    if resident_mode is None:
        return pl.BlockSpec(shape, index_map)
    return pl.BlockSpec(shape, index_map, pipeline_mode=resident_mode)


def _run_with_resident_weights(run):
    """Prefer single-buffered resident weights (halves their VMEM footprint at large
    dims); fall back to default buffering if this jax build rejects pipeline_mode."""
    if hasattr(pl, "Buffered"):
        try:
            return run(pl.Buffered(1))
        except Exception:
            pass
    return run(None)


# ---------------------------------------------------------------------------
# Forward pass
# ---------------------------------------------------------------------------

def mlp_forward(x, w1, w2, scale, bias, *, drop=0.0, compute_dtype=None):
    """MetaFormer Mlp forward.

    x:  (B, H, W, C) channels-last activations.
    w1: (C, HID), w2: (HID, C_out), stored as (in, out) == torch Linear.weight.T.
    scale, bias: StarReLU scalars. Returns (B, H, W, C_out) in x.dtype.
    """
    # TODO(synk): dropout with p > 0 would need pltpu.prng_seed/prng_random_bits.
    assert drop == 0.0, "dropout p > 0 not implemented (module default is 0.0)"
    B, H, W, C = x.shape
    HID = w1.shape[1]
    C_out = w2.shape[1]
    M = B * H * W
    out_dtype = x.dtype
    if compute_dtype is None:
        compute_dtype = x.dtype     # pass jnp.bfloat16 on v6e/v7x to halve DMA/weight bytes
    compute_dtype = jnp.dtype(compute_dtype)
    cbytes = compute_dtype.itemsize
    obytes = jnp.dtype(out_dtype).itemsize

    # ---- one-time param transform: fold StarReLU s, b into fc2 (f32) ----
    scale_f = jnp.asarray(scale, jnp.float32).reshape(())
    bias_f = jnp.asarray(bias, jnp.float32).reshape(())
    w2_f32 = w2.astype(jnp.float32)
    w2s_f32 = scale_f * w2_f32                        # (HID, C_out)
    bias_vec = bias_f * jnp.sum(w2_f32, axis=0)       # (C_out,) f32

    cap = _vmem_cap_bytes()
    cost = pl.CostEstimate(
        flops=2 * M * (C * HID + HID * C_out),
        transcendentals=0,
        bytes_accessed=int((M * C + C * HID + HID * C_out) * cbytes + M * C_out * obytes),
    )
    # TODO(synk): if the resident weights ever exceed ~cap/3 (e.g. dim>=1024 in f32),
    # add an 'arbitrary' HID-reduction grid axis + f32 accumulator instead of keeping
    # both weights fully resident.

    if C_out >= 128 and C >= 128:
        # ------------- token-major path: no wrapper transposes needed -------------
        x2d = x.reshape(M, C).astype(compute_dtype)             # free reshape
        w1c = w1.astype(compute_dtype)                          # (C, HID)
        w2s = w2s_f32.astype(compute_dtype)                     # (HID, C_out)
        bias_row = bias_vec.reshape(1, C_out)                   # (1, C_out) f32

        weight_bytes = (C * HID + HID * C_out) * cbytes + C_out * 4
        per_token = 2 * C * cbytes + 2 * C_out * obytes + (HID + C_out) * 4
        tm, steps = _pick_tile(M, per_token, weight_bytes, cap)
        vmem_limit = int(min(cap, max(weight_bytes + per_token * tm + (2 << 20), 16 << 20)))

        def run(resident_mode):
            return pl.pallas_call(
                _mlp_kernel_tmajor,
                out_shape=jax.ShapeDtypeStruct((M, C_out), out_dtype),
                grid_spec=pltpu.PrefetchScalarGridSpec(
                    num_scalar_prefetch=0,
                    grid=(steps,),
                    in_specs=[
                        pl.BlockSpec((tm, C), lambda i: (i, 0)),
                        _weight_spec((C, HID), resident_mode),
                        _weight_spec((HID, C_out), resident_mode),
                        _weight_spec((1, C_out), resident_mode),
                    ],
                    out_specs=pl.BlockSpec((tm, C_out), lambda i: (i, 0)),
                ),
                compiler_params=pltpu.CompilerParams(
                    dimension_semantics=("parallel",),
                    vmem_limit_bytes=vmem_limit,
                ),
                cost_estimate=cost,
            )(x2d, w1c, w2s, bias_row)

        out2d = _run_with_resident_weights(run)
        return out2d.reshape(B, H, W, C_out)

    # ------------- channel-major path: tokens on the 128-lane axis -------------
    Cp = -(-C_out // 8) * 8                           # sublane-full output rows
    w1T = w1.T.astype(compute_dtype)                  # (HID, C)
    w2Ts = w2s_f32.T                                  # (C_out, HID) f32
    bias_col = bias_vec.reshape(C_out, 1)
    if Cp != C_out:
        w2Ts = jnp.pad(w2Ts, ((0, Cp - C_out), (0, 0)))
        bias_col = jnp.pad(bias_col, ((0, Cp - C_out), (0, 0)))
    w2Ts = w2Ts.astype(compute_dtype)
    # Layout plumbing transpose is only paid while C_out < 128 (tiny channel counts).
    xT = x.reshape(M, C).T.astype(compute_dtype)      # (C, M)

    weight_bytes = (HID * C + Cp * HID) * cbytes + Cp * 4
    per_token = 2 * C * cbytes + 2 * Cp * obytes + (HID + Cp) * 4
    tm, steps = _pick_tile(M, per_token, weight_bytes, cap)
    vmem_limit = int(min(cap, max(weight_bytes + per_token * tm + (2 << 20), 16 << 20)))

    def run(resident_mode):
        return pl.pallas_call(
            _mlp_kernel_cmajor,
            out_shape=jax.ShapeDtypeStruct((Cp, M), out_dtype),
            grid_spec=pltpu.PrefetchScalarGridSpec(
                num_scalar_prefetch=0,
                grid=(steps,),
                in_specs=[
                    pl.BlockSpec((C, tm), lambda i: (0, i)),
                    _weight_spec((HID, C), resident_mode),
                    _weight_spec((Cp, HID), resident_mode),
                    _weight_spec((Cp, 1), resident_mode),
                ],
                out_specs=pl.BlockSpec((Cp, tm), lambda i: (0, i)),
            ),
            compiler_params=pltpu.CompilerParams(
                dimension_semantics=("parallel",),
                vmem_limit_bytes=vmem_limit,
            ),
            cost_estimate=cost,
        )(xT, w1T, w2Ts, bias_col)

    outT = _run_with_resident_weights(run)            # (Cp, M), no M pad/slice needed
    out2d = outT[:C_out].T                            # drop sublane padding rows + transpose
    return out2d.reshape(B, H, W, C_out)


# ---------------------------------------------------------------------------
# Reference + checks
# ---------------------------------------------------------------------------

def reference_mlp(x, w1, w2, scale, bias):
    h = jnp.einsum("bhwc,cd->bhwd", x, w1, precision="highest")
    h = scale * jnp.maximum(h, 0.0) ** 2 + bias
    return jnp.einsum("bhwd,dc->bhwc", h, w2, precision="highest")


if __name__ == "__main__":
    key = jax.random.PRNGKey(0)
    kx, k1, k2, kx2, k3, k4 = jax.random.split(key, 6)

    # Module config: dim=4, mlp_ratio=4 -> hidden=16, out_features=dim, bias=False, drop=0.0
    dim, hidden = 4, 16
    B, H, W = 2, 16, 16
    # PyTorch NCHW input [2, 4, 16, 16] == channels-last (2, 16, 16, 4) here.
    x = jax.random.normal(kx, (B, H, W, dim), dtype=jnp.float32)
    # Parameters stored as (in, out), i.e. W^T of the torch Linear weights.
    w1 = jax.random.normal(k1, (dim, hidden), dtype=jnp.float32) * 0.1
    w2 = jax.random.normal(k2, (hidden, dim), dtype=jnp.float32) * 0.1

    # --- 1) module-default StarReLU params (scale=1, bias=0), f32 compute ---
    scale = jnp.ones((1,), jnp.float32)
    bias = jnp.zeros((1,), jnp.float32)
    out = jax.block_until_ready(mlp_forward(x, w1, w2, scale, bias))
    ref = reference_mlp(x, w1, w2, scale[0], bias[0])
    assert out.shape == (B, H, W, dim)
    assert jnp.allclose(out, ref, atol=1e-4, rtol=1e-4), "f32 default-param mismatch"

    # --- 2) learned StarReLU params -> validates the scale/bias fold into fc2 ---
    scale2 = jnp.full((1,), 0.75, jnp.float32)
    bias2 = jnp.full((1,), 0.2, jnp.float32)
    out2 = jax.block_until_ready(mlp_forward(x, w1, w2, scale2, bias2))
    ref2 = reference_mlp(x, w1, w2, scale2[0], bias2[0])
    assert jnp.allclose(out2, ref2, atol=1e-4, rtol=1e-4), "f32 folded-param mismatch"

    # --- 3) bf16 compute dtype (halved DMA/weight bytes), f32 MXU accumulation ---
    out3 = jax.block_until_ready(
        mlp_forward(x, w1, w2, scale, bias, compute_dtype=jnp.bfloat16))
    assert jnp.allclose(out3, ref, atol=3e-2, rtol=3e-2), "bf16 path mismatch"

    # --- 4) token-major path (C, C_out >= 128): realistic stage width, no transposes ---
    dim2, hidden2 = 128, 512
    xb = jax.random.normal(kx2, (2, 8, 8, dim2), dtype=jnp.float32)
    w1b = jax.random.normal(k3, (dim2, hidden2), dtype=jnp.float32) * 0.05
    w2b = jax.random.normal(k4, (hidden2, dim2), dtype=jnp.float32) * 0.05
    out4 = jax.block_until_ready(mlp_forward(xb, w1b, w2b, scale2, bias2))
    ref4 = reference_mlp(xb, w1b, w2b, scale2[0], bias2[0])
    assert out4.shape == (2, 8, 8, dim2)
    assert jnp.allclose(out4, ref4, atol=1e-3, rtol=1e-3), "token-major path mismatch"

    print("KERNEL_OK")
</pallas_src>

<mosaic_0001>
module attributes {stable_mosaic.version = 11 : i64} {
  func.func @_mlp_kernel_cmajor(%arg0: i32, %arg1: memref<4x512xf32, #tpu.memory_space<vmem>>, %arg2: memref<16x4xf32, #tpu.memory_space<vmem>>, %arg3: memref<8x16xf32, #tpu.memory_space<vmem>>, %arg4: memref<8x1xf32, #tpu.memory_space<vmem>>, %arg5: memref<8x512xf32, #tpu.memory_space<vmem>>) attributes {dimension_semantics = [#tpu.dimension_semantics<parallel>], iteration_bounds = array<i64: 1>, scalar_prefetch = 0 : i64, scratch_operands = 0 : i64, tpu.core_type = #tpu.core_type<tc>, window_params = [{transform_indices = @transform_0, window_bounds = array<i64: 4, 512>}, {pipeline_mode = #tpu.pipeline_mode<synchronous>, transform_indices = @transform_1, window_bounds = array<i64: 16, 4>}, {pipeline_mode = #tpu.pipeline_mode<synchronous>, transform_indices = @transform_2, window_bounds = array<i64: 8, 16>}, {pipeline_mode = #tpu.pipeline_mode<synchronous>, transform_indices = @transform_3, window_bounds = array<i64: 8, 1>}, {transform_indices = @transform_4, window_bounds = array<i64: 8, 512>}]} {
    %c0 = arith.constant 0 : index
    %c0_0 = arith.constant 0 : index
    %0 = vector.load %arg2[%c0, %c0_0] : memref<16x4xf32, #tpu.memory_space<vmem>>, vector<16x4xf32>
    %c0_1 = arith.constant 0 : index
    %c0_2 = arith.constant 0 : index
    %1 = vector.load %arg1[%c0_1, %c0_2] : memref<4x512xf32, #tpu.memory_space<vmem>>, vector<4x512xf32>
    %cst = arith.constant dense<0.000000e+00> : vector<16x512xf32>
    %2 = tpu.matmul %0, %1, %cst {dimension_numbers = #tpu.dot_dimension_numbers<[1], [0], [0], [1], [0, 0, 1, 1], [], []>} : vector<16x4xf32>, vector<4x512xf32>, vector<16x512xf32> -> vector<16x512xf32>
    %cst_3 = arith.constant 0.000000e+00 : f32
    %3 = vector.broadcast %cst_3 : f32 to vector<16x512xf32>
    %4 = arith.maximumf %2, %3 : vector<16x512xf32>
    %5 = arith.mulf %4, %4 : vector<16x512xf32>
    %c0_4 = arith.constant 0 : index
    %c0_5 = arith.constant 0 : index
    %6 = vector.load %arg3[%c0_4, %c0_5] : memref<8x16xf32, #tpu.memory_space<vmem>>, vector<8x16xf32>
    %cst_6 = arith.constant dense<0.000000e+00> : vector<8x512xf32>
    %7 = tpu.matmul %6, %5, %cst_6 {dimension_numbers = #tpu.dot_dimension_numbers<[1], [0], [0], [1], [0, 0, 1, 1], [], []>} : vector<8x16xf32>, vector<16x512xf32>, vector<8x512xf32> -> vector<8x512xf32>
    %c0_7 = arith.constant 0 : index
    %c0_8 = arith.constant 0 : index
    %8 = vector.load %arg4[%c0_7, %c0_8] : memref<8x1xf32, #tpu.memory_space<vmem>>, vector<8x1xf32>
    %9 = vector.broadcast %8 : vector<8x1xf32> to vector<8x512xf32>
    %10 = arith.addf %7, %9 : vector<8x512xf32>
    %c0_9 = arith.constant 0 : index
    %c0_10 = arith.constant 0 : index
    %11 = vector.load %arg5[%c0_9, %c0_10] : memref<8x512xf32, #tpu.memory_space<vmem>>, vector<8x512xf32>
    tpu.vector_store %arg5[%c0_9, %c0_10], %10 {strides = array<i32>} : memref<8x512xf32, #tpu.memory_space<vmem>>, vector<8x512xf32>,
    return
  }
  func.func @transform_0(%arg0: i32) -> (i32, i32) {
    %c0_i32 = arith.constant 0 : i32
    %c0_i32_0 = arith.constant 0 : i32
    return %c0_i32, %arg0 : i32, i32
  }
  func.func @transform_1(%arg0: i32) -> (i32, i32) {
    %c0_i32 = arith.constant 0 : i32
    %c0_i32_0 = arith.constant 0 : i32
    %c0_i32_1 = arith.constant 0 : i32
    return %c0_i32, %c0_i32_0 : i32, i32
  }
  func.func @transform_2(%arg0: i32) -> (i32, i32) {
    %c0_i32 = arith.constant 0 : i32
    %c0_i32_0 = arith.constant 0 : i32
    %c0_i32_1 = arith.constant 0 : i32
    return %c0_i32, %c0_i32_0 : i32, i32
  }
  func.func @transform_3(%arg0: i32) -> (i32, i32) {
    %c0_i32 = arith.constant 0 : i32
    %c0_i32_0 = arith.constant 0 : i32
    %c0_i32_1 = arith.constant 0 : i32
    return %c0_i32, %c0_i32_0 : i32, i32
  }
  func.func @transform_4(%arg0: i32) -> (i32, i32) {
    %c0_i32 = arith.constant 0 : i32
    %c0_i32_0 = arith.constant 0 : i32
    return %c0_i32, %arg0 : i32, i32
  }
}

module attributes {stable_mosaic.version = 11 : i64} {
  func.func @_mlp_kernel_cmajor(%arg0: i32, %arg1: memref<4x512xf32, #tpu.memory_space<vmem>>, %arg2: memref<16x4xf32, #tpu.memory_space<vmem>>, %arg3: memref<8x16xf32, #tpu.memory_space<vmem>>, %arg4: memref<8x1xf32, #tpu.memory_space<vmem>>, %arg5: memref<8x512xf32, #tpu.memory_space<vmem>>) attributes {dimension_semantics = [#tpu.dimension_semantics<parallel>], iteration_bounds = array<i64: 1>, scalar_prefetch = 0 : i64, scratch_operands = 0 : i64, tpu.core_type = #tpu.core_type<tc>, window_params = [{transform_indices = @transform_0, window_bounds = array<i64: 4, 512>}, {pipeline_mode = #tpu.pipeline_mode<synchronous>, transform_indices = @transform_1, window_bounds = array<i64: 16, 4>}, {pipeline_mode = #tpu.pipeline_mode<synchronous>, transform_indices = @transform_2, window_bounds = array<i64: 8, 16>}, {pipeline_mode = #tpu.pipeline_mode<synchronous>, transform_indices = @transform_3, window_bounds = array<i64: 8, 1>}, {transform_indices = @transform_4, window_bounds = array<i64: 8, 512>}]} {
    %c0 = arith.constant 0 : index
    %c0_0 = arith.constant 0 : index
    %0 = vector.load %arg2[%c0, %c0_0] : memref<16x4xf32, #tpu.memory_space<vmem>>, vector<16x4xf32>
    %c0_1 = arith.constant 0 : index
    %c0_2 = arith.constant 0 : index
    %1 = vector.load %arg1[%c0_1, %c0_2] : memref<4x512xf32, #tpu.memory_space<vmem>>, vector<4x512xf32>
    %cst = arith.constant dense<0.000000e+00> : vector<16x512xf32>
    %2 = tpu.matmul %0, %1, %cst {dimension_numbers = #tpu.dot_dimension_numbers<[1], [0], [0], [1], [0, 0, 1, 1], [], []>} : vector<16x4xf32>, vector<4x512xf32>, vector<16x512xf32> -> vector<16x512xf32>
    %cst_3 = arith.constant 0.000000e+00 : f32
    %3 = vector.broadcast %cst_3 : f32 to vector<16x512xf32>
    %4 = arith.maximumf %2, %3 : vector<16x512xf32>
    %5 = arith.mulf %4, %4 : vector<16x512xf32>
    %c0_4 = arith.constant 0 : index
    %c0_5 = arith.constant 0 : index
    %6 = vector.load %arg3[%c0_4, %c0_5] : memref<8x16xf32, #tpu.memory_space<vmem>>, vector<8x16xf32>
    %cst_6 = arith.constant dense<0.000000e+00> : vector<8x512xf32>
    %7 = tpu.matmul %6, %5, %cst_6 {dimension_numbers = #tpu.dot_dimension_numbers<[1], [0], [0], [1], [0, 0, 1, 1], [], []>} : vector<8x16xf32>, vector<16x512xf32>, vector<8x512xf32> -> vector<8x512xf32>
    %c0_7 = arith.constant 0 : index
    %c0_8 = arith.constant 0 : index
    %8 = vector.load %arg4[%c0_7, %c0_8] : memref<8x1xf32, #tpu.memory_space<vmem>>, vector<8x1xf32>
    %9 = vector.broadcast %8 : vector<8x1xf32> to vector<8x512xf32>
    %10 = arith.addf %7, %9 : vector<8x512xf32>
    %c0_9 = arith.constant 0 : index
    %c0_10 = arith.constant 0 : index
    %11 = vector.load %arg5[%c0_9, %c0_10] : memref<8x512xf32, #tpu.memory_space<vmem>>, vector<8x512xf32>
    tpu.vector_store %arg5[%c0_9, %c0_10], %10 {strides = array<i32>} : memref<8x512xf32, #tpu.memory_space<vmem>>, vector<8x512xf32>,
    return
  }
  func.func @transform_0(%arg0: i32) -> (i32, i32) {
    %c0_i32 = arith.constant 0 : i32
    %c0_i32_0 = arith.constant 0 : i32
    return %c0_i32, %arg0 : i32, i32
  }
  func.func @transform_1(%arg0: i32) -> (i32, i32) {
    %c0_i32 = arith.constant 0 : i32
    %c0_i32_0 = arith.constant 0 : i32
    %c0_i32_1 = arith.constant 0 : i32
    return %c0_i32, %c0_i32_0 : i32, i32
  }
  func.func @transform_2(%arg0: i32) -> (i32, i32) {
    %c0_i32 = arith.constant 0 : i32
    %c0_i32_0 = arith.constant 0 : i32
    %c0_i32_1 = arith.constant 0 : i32
    return %c0_i32, %c0_i32_0 : i32, i32
  }
  func.func @transform_3(%arg0: i32) -> (i32, i32) {
    %c0_i32 = arith.constant 0 : i32
    %c0_i32_0 = arith.constant 0 : i32
    %c0_i32_1 = arith.constant 0 : i32
    return %c0_i32, %c0_i32_0 : i32, i32
  }
  func.func @transform_4(%arg0: i32) -> (i32, i32) {
    %c0_i32 = arith.constant 0 : i32
    %c0_i32_0 = arith.constant 0 : i32
    return %c0_i32, %arg0 : i32, i32
  }
}

</mosaic_0001>

<bundles_post_ra>
// kernel: tpu_custom_call.1
= control target key start
LH: loop header
LB: loop body
LE: loop exit
PB: predicated region body
PF: predicated region fallthrough
CT: control target
= control target key end

     0   :  { %vm33_vm0 = vcmask 1043456   ;;  %v431_v4 = vmov 0.0   ;;  %s489_s0 = inlined_call_operand.vmem [shape: f32[4,512], index: 0, kind: input, shape index: {}]   ;;  %s490_s1 = inlined_call_operand.vmem [shape: f32[16,4], index: 1, kind: input, shape index: {}]   ;;  %s491_s2 = inlined_call_operand.vmem [shape: f32[8,16], index: 2, kind: input, shape index: {}]   ;;  %s492_s3 = inlined_call_operand.vmem [shape: f32[8,1], index: 3, kind: input, shape index: {}]   ;;  %s493_s4 = inlined_call_operand.hbm [shape: f32[8,512], index: 4, kind: output, shape index: {}]  }
   0x1   :  { %v20_v0 = vld [vmem:[%s489_s0] sm:$0xff]  ;;  %v21_v1 = vld [vmem:[%s489_s0 + $0x8] sm:$0xff]  ;;  %106 = vmatprep.mubr.f32.mxu0 %v431_v4  ;;  %183 = vmatprep.mubr.f32.mxu1 %v431_v4 }
   0x2   :  { %v24_v2 = vcombine.high %v20_v0, %v20_v0  ;;  %v25_v3 = vcombine.high %v21_v1, %v21_v1 }
   0x3   :  { %9 = vsyncpa [#allocation3], 0  ;;  %v18_v5 = vld [vmem:[%s490_s1] sm:$0xff]  ;;  %vm26_vm1 = vcmask 31744   ;;  %v19_v6 = vld [vmem:[%s490_s1 + $0x8] sm:$0xff]  ;;  %v432_v8 = vmov 0  }
   0x4   :  { %383 = vmatprep.subr.msk.mxu0 %vm33_vm0, %v24_v2  ;;  %387 = vmatprep.subr.msk.mxu1 %vm33_vm0, %v25_v3  ;;  %v213_v7 = vld [vmem:[%s492_s3] sm:$0xff]  ;;  %vm219_vm2 = vcmask 130048   ;;  %s433_s24 = smov [#allocation2]  }
   0x5   :  { %384 = vmatpush1.msk.msra.mxu0 %vm33_vm0, %v20_v0  ;;  %388 = vmatpush1.msk.msra.mxu1 %vm33_vm0, %v21_v1  ;;  %v212_v37 = vld [vmem:[%s491_s2] sm:$0xff]  ;;  %s375_s25 = sshll.u32 %s433_s24, 4  ;;  %s376_s25 = int_to_ptr.vmem [resolvable:$true] %s375_s25 }
   0x6   :  { %385 = vmatmul.mubr.msk.f32.vlgmr.msra.gmra.mrb[0].mxu0 %vm26_vm1, %v18_v5  ;;  %389 = vmatmul.mubr.msk.f32.vlgmr.msra.gmra.mrb[0].mxu1 %vm26_vm1, %v18_v5  ;;  %s407_s2 = scalar_lea.vmem %s376_s25, 512  ;;  %p412_p1 = scmp.lt.s32.totalorder %s376_s25, %s376_s25 }
   0x7   :  { %112 = vmatprep.mubr.f32.mxu0 %v431_v4  ;;  %189 = vmatprep.mubr.f32.mxu1 %v431_v4  ;;  %p408_p0 = scmp.ne.s32.totalorder %s376_s25, %s407_s2  ;;  %p413_p2 = scmp.lt.s32.totalorder %s407_s2, %s407_s2 }
   0x8   :  { %404 = vset.pattern.permute.xlu0 %v432_v8 }
   0x9   :  { %216 = vperm.xlu0 %404, %v213_v7   ;;  %p414_p3 = por %p413_p2, %p412_p1 }
   0xa   :  { %386 = vmatmul.mubr.msk.f32.gmra.mrb[2].mxu0 %vm26_vm1, %v19_v6  ;;  %390 = vmatmul.mubr.msk.f32.gmra.mrb[2].mxu1 %vm26_vm1, %v19_v6 }
   0xb   :  { %287 = vmatprep.mubr.f32.mxu0 %v431_v4  ;;  %358 = vmatprep.mubr.f32.mxu1 %v431_v4  ;;  %p415_p4 = pnand %p414_p3, %p408_p0 }
  0x88   :  { %v217_v38 = vpop.permute.xlu0 %216 }
  0xd9   :  { %v108_v9 = vpop.f32.mrb[0].mxu0  ;;  %v185_v10 = vpop.f32.mrb[0].mxu1 }
  0xda   :  { %v110_v11 = vpop.f32.mrb[1].mxu0  ;;  %v187_v12 = vpop.f32.mrb[1].mxu1  ;;  %v196_v13 = vmax.f32 %v108_v9, 0.0  ;;  %v198_v14 = vmax.f32 %v185_v10, 0.0 }
  0xdb   :  { %v197_v15 = vmax.f32 %v110_v11, 0.0  ;;  %v199_v16 = vmax.f32 %v187_v12, 0.0 }
  0xdc   :  { %v204_v25 = vmul.f32 %v196_v13, %v196_v13  ;;  %v206_v26 = vmul.f32 %v198_v14, %v198_v14 }
  0xdd   :  { %v114_v17 = vpop.f32.mrb[2].mxu0  ;;  %v191_v18 = vpop.f32.mrb[2].mxu1  ;;  %v205_v29 = vmul.f32 %v197_v15, %v197_v15  ;;  %v207_v30 = vmul.f32 %v199_v16, %v199_v16 }
  0xde   :  { %v200_v19 = vmax.f32 %v114_v17, 0.0  ;;  %v202_v20 = vmax.f32 %v191_v18, 0.0  ;;  %v116_v21 = vpop.f32.mrb[3].mxu0  ;;  %v193_v22 = vpop.f32.mrb[3].mxu1 }
  0xdf   :  { %v201_v23 = vmax.f32 %v116_v21, 0.0  ;;  %v203_v24 = vmax.f32 %v193_v22, 0.0 }
  0xe0   :  { %v208_v27 = vmul.f32 %v200_v19, %v200_v19  ;;  %v210_v28 = vmul.f32 %v202_v20, %v202_v20 }
  0xe1   :  { %v209_v31 = vmul.f32 %v201_v23, %v201_v23  ;;  %v211_v32 = vmul.f32 %v203_v24, %v203_v24 }
  0xe2   :  { %v395_v33 = vpack.c.bf16 %v208_v27, %v204_v25  ;;  %v399_v34 = vpack.c.bf16 %v210_v28, %v206_v26 }
  0xe3   :  { %v393_v35 = vpack.c.bf16 %v209_v31, %v205_v29  ;;  %v397_v36 = vpack.c.bf16 %v211_v32, %v207_v30 }
  0xe5   :  { %394 = vmatprep.subr.bf16.mxu0 %v393_v35  ;;  %398 = vmatprep.subr.bf16.mxu1 %v397_v36 }
  0xe6   :  { %396 = vmatpush1.bf16.msra.mxu0 %v395_v33  ;;  %400 = vmatpush1.bf16.msra.mxu1 %v399_v34 }
  0xe9   :  { %391 = vmatmul.mubr.msk.f32.vlgmr.msra.gmra.mrb[4].mxu0 %vm219_vm2, %v212_v37  ;;  %392 = vmatmul.mubr.msk.f32.vlgmr.msra.gmra.mrb[4].mxu1 %vm219_vm2, %v212_v37 }
 0x1bc   :  { %v289_v39 = vpop.f32.mrb[4].mxu0  ;;  %v360_v40 = vpop.f32.mrb[4].mxu1 }
 0x1bd   :  { %v290_v41 = vadd.f32 %v289_v39, %v217_v38  ;;  %v361_v42 = vadd.f32 %v360_v40, %v217_v38  ;;  %v291_v43 = vpop.f32.mrb[5].mxu0  ;;  %v362_v44 = vpop.f32.mrb[5].mxu1 }
 0x1be   :  { %v292_v45 = vadd.f32 %v291_v43, %v217_v38  ;;  %v363_v46 = vadd.f32 %v362_v44, %v217_v38 }
 0x1bf   :  { %365 = vst [vmem:[#allocation2] sm:$0xff] %v290_v41  ;;  %367 = vst [vmem:[#allocation2 + $0x10] sm:$0xff] %v361_v42 }
 0x1c0   :  { %366 = vst [vmem:[#allocation2 + $0x8] sm:$0xff] %v292_v45  ;;  %368 = vst [vmem:[#allocation2 + $0x18] sm:$0xff] %v363_v46 }
 0x1c1   :  { %418 = shalt.err (!%p415_p4)
}
 0x1c2   :  { %s419_s28 = scalar_lea.hbm %s493_s4, 512 }
 0x1c3   :  { %p420_p5 = scmp.ne.s32.totalorder %s493_s4, %s419_s28  ;;  %p423_p6 = scmp.lt.u32.totalorder %s419_s28, %s493_s4 }
 0x1c5   :  { %p425_p7 = pnand %p423_p6, %p420_p5 }
 0x1c7   :  { %428 = shalt.err (!%p425_p7)
}
 0x1c8   :  { %378 = dma.vmem_to_hbm [thread:$0]  %s376_s25, 512, %s493_s4, [#allocation3]  }
 0x1c9   :  { %429 = dma.done.wait [#allocation3], 512  }
 0x1ca   :  { %430 = vsyncadd [#allocation3], 4294966784 }
 0x1cb   :  { %382 = vsyncpa [#allocation3], 1 }

// kernel: tpu_custom_call.1
= control target key start
LH: loop header
LB: loop body
LE: loop exit
PB: predicated region body
PF: predicated region fallthrough
CT: control target
= control target key end

     0   :  { %vm33_vm0 = vcmask 1043456   ;;  %v431_v4 = vmov 0.0   ;;  %s489_s0 = inlined_call_operand.vmem [shape: f32[4,512], index: 0, kind: input, shape index: {}]   ;;  %s490_s1 = inlined_call_operand.vmem [shape: f32[16,4], index: 1, kind: input, shape index: {}]   ;;  %s491_s2 = inlined_call_operand.vmem [shape: f32[8,16], index: 2, kind: input, shape index: {}]   ;;  %s492_s3 = inlined_call_operand.vmem [shape: f32[8,1], index: 3, kind: input, shape index: {}]   ;;  %s493_s4 = inlined_call_operand.hbm [shape: f32[8,512], index: 4, kind: output, shape index: {}]  }
   0x1   :  { %v20_v0 = vld [vmem:[%s489_s0] sm:$0xff]  ;;  %v21_v1 = vld [vmem:[%s489_s0 + $0x8] sm:$0xff]  ;;  %106 = vmatprep.mubr.f32.mxu0 %v431_v4  ;;  %183 = vmatprep.mubr.f32.mxu1 %v431_v4 }
   0x2   :  { %v24_v2 = vcombine.high %v20_v0, %v20_v0  ;;  %v25_v3 = vcombine.high %v21_v1, %v21_v1 }
   0x3   :  { %9 = vsyncpa [#allocation3], 0  ;;  %v18_v5 = vld [vmem:[%s490_s1] sm:$0xff]  ;;  %vm26_vm1 = vcmask 31744   ;;  %v19_v6 = vld [vmem:[%s490_s1 + $0x8] sm:$0xff]  ;;  %v432_v8 = vmov 0  }
   0x4   :  { %383 = vmatprep.subr.msk.mxu0 %vm33_vm0, %v24_v2  ;;  %387 = vmatprep.subr.msk.mxu1 %vm33_vm0, %v25_v3  ;;  %v213_v7 = vld [vmem:[%s492_s3] sm:$0xff]  ;;  %vm219_vm2 = vcmask 130048   ;;  %s433_s24 = smov [#allocation2]  }
   0x5   :  { %384 = vmatpush1.msk.msra.mxu0 %vm33_vm0, %v20_v0  ;;  %388 = vmatpush1.msk.msra.mxu1 %vm33_vm0, %v21_v1  ;;  %v212_v37 = vld [vmem:[%s491_s2] sm:$0xff]  ;;  %s375_s25 = sshll.u32 %s433_s24, 4  ;;  %s376_s25 = int_to_ptr.vmem [resolvable:$true] %s375_s25 }
   0x6   :  { %385 = vmatmul.mubr.msk.f32.vlgmr.msra.gmra.mrb[0].mxu0 %vm26_vm1, %v18_v5  ;;  %389 = vmatmul.mubr.msk.f32.vlgmr.msra.gmra.mrb[0].mxu1 %vm26_vm1, %v18_v5  ;;  %s407_s2 = scalar_lea.vmem %s376_s25, 512  ;;  %p412_p1 = scmp.lt.s32.totalorder %s376_s25, %s376_s25 }
   0x7   :  { %112 = vmatprep.mubr.f32.mxu0 %v431_v4  ;;  %189 = vmatprep.mubr.f32.mxu1 %v431_v4  ;;  %p408_p0 = scmp.ne.s32.totalorder %s376_s25, %s407_s2  ;;  %p413_p2 = scmp.lt.s32.totalorder %s407_s2, %s407_s2 }
   0x8   :  { %404 = vset.pattern.permute.xlu0 %v432_v8 }
   0x9   :  { %216 = vperm.xlu0 %404, %v213_v7   ;;  %p414_p3 = por %p413_p2, %p412_p1 }
   0xa   :  { %386 = vmatmul.mubr.msk.f32.gmra.mrb[2].mxu0 %vm26_vm1, %v19_v6  ;;  %390 = vmatmul.mubr.msk.f32.gmra.mrb[2].mxu1 %vm26_vm1, %v19_v6 }
   0xb   :  { %287 = vmatprep.mubr.f32.mxu0 %v431_v4  ;;  %358 = vmatprep.mubr.f32.mxu1 %v431_v4  ;;  %p415_p4 = pnand %p414_p3, %p408_p0 }
  0x88   :  { %v217_v38 = vpop.permute.xlu0 %216 }
  0xd9   :  { %v108_v9 = vpop.f32.mrb[0].mxu0  ;;  %v185_v10 = vpop.f32.mrb[0].mxu1 }
  0xda   :  { %v110_v11 = vpop.f32.mrb[1].mxu0  ;;  %v187_v12 = vpop.f32.mrb[1].mxu1  ;;  %v196_v13 = vmax.f32 %v108_v9, 0.0  ;;  %v198_v14 = vmax.f32 %v185_v10, 0.0 }
  0xdb   :  { %v197_v15 = vmax.f32 %v110_v11, 0.0  ;;  %v199_v16 = vmax.f32 %v187_v12, 0.0 }
  0xdc   :  { %v204_v25 = vmul.f32 %v196_v13, %v196_v13  ;;  %v206_v26 = vmul.f32 %v198_v14, %v198_v14 }
  0xdd   :  { %v114_v17 = vpop.f32.mrb[2].mxu0  ;;  %v191_v18 = vpop.f32.mrb[2].mxu1  ;;  %v205_v29 = vmul.f32 %v197_v15, %v197_v15  ;;  %v207_v30 = vmul.f32 %v199_v16, %v199_v16 }
  0xde   :  { %v200_v19 = vmax.f32 %v114_v17, 0.0  ;;  %v202_v20 = vmax.f32 %v191_v18, 0.0  ;;  %v116_v21 = vpop.f32.mrb[3].mxu0  ;;  %v193_v22 = vpop.f32.mrb[3].mxu1 }
  0xdf   :  { %v201_v23 = vmax.f32 %v116_v21, 0.0  ;;  %v203_v24 = vmax.f32 %v193_v22, 0.0 }
  0xe0   :  { %v208_v27 = vmul.f32 %v200_v19, %v200_v19  ;;  %v210_v28 = vmul.f32 %v202_v20, %v202_v20 }
  0xe1   :  { %v209_v31 = vmul.f32 %v201_v23, %v201_v23  ;;  %v211_v32 = vmul.f32 %v203_v24, %v203_v24 }
  0xe2   :  { %v395_v33 = vpack.c.bf16 %v208_v27, %v204_v25  ;;  %v399_v34 = vpack.c.bf16 %v210_v28, %v206_v26 }
  0xe3   :  { %v393_v35 = vpack.c.bf16 %v209_v31, %v205_v29  ;;  %v397_v36 = vpack.c.bf16 %v211_v32, %v207_v30 }
  0xe5   :  { %394 = vmatprep.subr.bf16.mxu0 %v393_v35  ;;  %398 = vmatprep.subr.bf16.mxu1 %v397_v36 }
  0xe6   :  { %396 = vmatpush1.bf16.msra.mxu0 %v395_v33  ;;  %400 = vmatpush1.bf16.msra.mxu1 %v399_v34 }
  0xe9   :  { %391 = vmatmul.mubr.msk.f32.vlgmr.msra.gmra.mrb[4].mxu0 %vm219_vm2, %v212_v37  ;;  %392 = vmatmul.mubr.msk.f32.vlgmr.msra.gmra.mrb[4].mxu1 %vm219_vm2, %v212_v37 }
 0x1bc   :  { %v289_v39 = vpop.f32.mrb[4].mxu0  ;;  %v360_v40 = vpop.f32.mrb[4].mxu1 }
 0x1bd   :  { %v290_v41 = vadd.f32 %v289_v39, %v217_v38  ;;  %v361_v42 = vadd.f32 %v360_v40, %v217_v38  ;;  %v291_v43 = vpop.f32.mrb[5].mxu0  ;;  %v362_v44 = vpop.f32.mrb[5].mxu1 }
 0x1be   :  { %v292_v45 = vadd.f32 %v291_v43, %v217_v38  ;;  %v363_v46 = vadd.f32 %v362_v44, %v217_v38 }
 0x1bf   :  { %365 = vst [vmem:[#allocation2] sm:$0xff] %v290_v41  ;;  %367 = vst [vmem:[#allocation2 + $0x10] sm:$0xff] %v361_v42 }
 0x1c0   :  { %366 = vst [vmem:[#allocation2 + $0x8] sm:$0xff] %v292_v45  ;;  %368 = vst [vmem:[#allocation2 + $0x18] sm:$0xff] %v363_v46 }
 0x1c1   :  { %418 = shalt.err (!%p415_p4)
}
 0x1c2   :  { %s419_s28 = scalar_lea.hbm %s493_s4, 512 }
 0x1c3   :  { %p420_p5 = scmp.ne.s32.totalorder %s493_s4, %s419_s28  ;;  %p423_p6 = scmp.lt.u32.totalorder %s419_s28, %s493_s4 }
 0x1c5   :  { %p425_p7 = pnand %p423_p6, %p420_p5 }
 0x1c7   :  { %428 = shalt.err (!%p425_p7)
}
 0x1c8   :  { %378 = dma.vmem_to_hbm [thread:$0]  %s376_s25, 512, %s493_s4, [#allocation3]  }
 0x1c9   :  { %429 = dma.done.wait [#allocation3], 512  }
 0x1ca   :  { %430 = vsyncadd [#allocation3], 4294966784 }
 0x1cb   :  { %382 = vsyncpa [#allocation3], 1 }

</bundles_post_ra>
